<compile_context>
chip_gen: v7x
topology: tpu7x:2x2x1
jax: 0.10.0
libtpu: 0.0.40
codegen_flags: <defaults>
</compile_context>

<pallas_src>
import jax
import jax.numpy as jnp
from jax.experimental import pallas as pl
from jax.experimental.pallas import tpu as pltpu

IGNORE_INDEX = -1  # module default


def _ce2d_kernel(x_ref, t_ref, sum_ref, acc_loss):
    """Per-tile: logsumexp over channels, pick target logit, masked accumulate.

    x_ref:    (C, rows, 128) float   -- logits tile (channels on leading axis)
    t_ref:    (rows, 128)    int32   -- targets tile (-1 = ignore)
    sum_ref:  (1, 1)         float32 -- per-(n, outer) summed NLL (output)
    acc_loss: (rows, 128)    float32 -- full-vreg loss accumulator (scratch)
    """
    i = pl.program_id(2)

    @pl.when(i == 0)
    def _init():
        acc_loss[...] = jnp.zeros_like(acc_loss)

    x = x_ref[...].astype(jnp.float32)          # (C, rows, 128)
    t = t_ref[...]                              # (rows, 128)

    # logsumexp over channels: cross-vreg VPU max/add, EUP exp/log.
    m = jnp.max(x, axis=0)                                         # (rows, 128)
    lse = jnp.log(jnp.sum(jnp.exp(x - m[None]), axis=0)) + m       # (rows, 128)

    # Target-class logit via a (C,1,1) iota broadcast (no full-size iota).
    C = x.shape[0]
    class_ids = jax.lax.broadcasted_iota(jnp.int32, (C, 1, 1), 0)  # (C, 1, 1)
    x_t = jnp.sum(jnp.where(class_ids == t[None], x, 0.0), axis=0)  # (rows, 128)

    # Masked accumulate with select semantics (swallows any unspecified data
    # in out-of-range / duplicated edge tiles, whose targets are -1).
    valid = t != IGNORE_INDEX
    acc_loss[...] += jnp.where(valid, lse - x_t, 0.0)

    @pl.when(i == pl.num_programs(2) - 1)
    def _finalize():
        sum_ref[...] = jnp.sum(acc_loss[...], axis=(0, 1), keepdims=True)


def _device_kind():
    try:
        return jax.devices()[0].device_kind.lower()
    except Exception:
        return ""


def _num_tensorcores():
    # v7x has 2 TensorCores per chip; v5e/v6e have 1.
    kind = _device_kind()
    return 2 if ("v7" in kind or "7x" in kind) else 1


def _vmem_limit_bytes():
    """Per-generation scoped VMEM limit (<=48 MiB on v7x, <=96 MiB on v5e/v6e)."""
    cap = 64 * 1024 * 1024
    try:
        info = pltpu.get_tpu_info()
        cap = int(getattr(info, "vmem_capacity_bytes", cap))
    except Exception:
        pass
    limit = min(cap * 3 // 4, 96 * 1024 * 1024)
    kind = _device_kind()
    if "v7" in kind or "7x" in kind:
        limit = min(limit, 48 * 1024 * 1024)   # 64 MiB physical per TC on v7x
    return int(limit)


@jax.jit
def cross_entropy_loss_2d(inputs, targets):
    """Equivalent of CrossEntropyLoss2d().forward(inputs, targets).

    inputs:  (N, C, H, W) float logits (f32 or bf16; math is done in f32)
    targets: (N, H, W)    int class indices in [0, C) or -1 (ignored)
    returns: float32 scalar mean NLL over non-ignored pixels (size_average=True).
    """
    N, C, H, W = inputs.shape
    HW = H * W
    itemsize = jnp.dtype(inputs.dtype).itemsize

    # ---- layout: (N, C, R, 128) with R = ceil(HW / 128) -------------------
    R = pl.cdiv(HW, 128)
    if HW % 128 == 0:
        x = inputs.reshape(N, C, R, 128)                 # free reshape
    else:
        # One-time HBM pad of the logits only for non-128-multiple HW; padded
        # lanes are masked via targets == -1 below.
        x = jnp.pad(inputs.reshape(N, C, HW),
                    ((0, 0), (0, 0), (0, R * 128 - HW))).reshape(N, C, R, 128)

    # ---- tile sizing: ~4 MiB x tiles, bounded by the VMEM budget ----------
    vmem_limit = _vmem_limit_bytes()
    target_bytes = 4 * 1024 * 1024
    rows_from_target = max(8, (target_bytes // (C * 128 * itemsize)) // 8 * 8)
    budget = (vmem_limit * 6) // 10
    # 2x double-buffered x tile + 2x targets tile + 1x f32 accumulator.
    per_row = 2 * C * 128 * itemsize + 3 * 128 * 4
    rows_from_vmem = max(8, (budget // per_row) // 8 * 8)
    # TODO(synk): add a C-chunked online-logsumexp fallback for vocab-scale C
    # where even an 8-row whole-C tile exceeds the VMEM budget (v7x: 64 MiB).
    tile_rows = min(rows_from_target, rows_from_vmem)
    if R <= tile_rows:
        tile_rows = R                                    # full-dim block

    n_blocks = pl.cdiv(R, tile_rows)
    n_outer = 2 if (_num_tensorcores() >= 2 and n_blocks >= 2) else 1
    n_inner = pl.cdiv(n_blocks, n_outer)
    R_pad = n_outer * n_inner * tile_rows

    # Pad only the tiny int32 targets so every grid step reads in-bounds
    # targets; out-of-range / duplicated logit tiles contribute nothing.
    t = targets.reshape(N, HW).astype(jnp.int32)
    if R_pad * 128 != HW:
        t = jnp.pad(t, ((0, 0), (0, R_pad * 128 - HW)),
                    constant_values=IGNORE_INDEX)
    t = t.reshape(N, R_pad, 128)

    last_blk = n_blocks - 1
    x_map = lambda n, o, i: (n, 0, jnp.minimum(o * n_inner + i, last_blk), 0)
    t_map = lambda n, o, i: (n, o * n_inner + i, 0)
    o_map = lambda n, o, i: (n, o, 0, 0)

    sum_out = pl.pallas_call(
        _ce2d_kernel,
        out_shape=jax.ShapeDtypeStruct((N, n_outer, 1, 1), jnp.float32),
        grid_spec=pltpu.PrefetchScalarGridSpec(
            num_scalar_prefetch=0,
            grid=(N, n_outer, n_inner),
            in_specs=[
                pl.BlockSpec((None, C, tile_rows, 128), x_map),
                pl.BlockSpec((None, tile_rows, 128), t_map),
            ],
            out_specs=pl.BlockSpec((None, None, 1, 1), o_map),
            scratch_shapes=[
                pltpu.VMEM((tile_rows, 128), jnp.float32),
            ],
        ),
        compiler_params=pltpu.CompilerParams(
            dimension_semantics=("parallel", "parallel", "arbitrary"),
            vmem_limit_bytes=vmem_limit,
        ),
    )(x, t)

    total = jnp.sum(sum_out)
    # Valid-pixel count computed outside the kernel (tiny targets array).
    count = jnp.sum((targets.astype(jnp.int32) != IGNORE_INDEX)
                    .astype(jnp.float32))
    # TODO(synk): 0/0 = NaN when every pixel is ignored (matches an empty
    # size_average reduction); no guard added to keep PyTorch-like semantics.
    return total / count


def _reference(inputs, targets):
    """Plain-JAX reference matching F.log_softmax(dim=1) + NLLLoss2d."""
    logp = jax.nn.log_softmax(inputs.astype(jnp.float32), axis=1)  # (N,C,H,W)
    t = targets.astype(jnp.int32)
    valid = t != IGNORE_INDEX
    t_safe = jnp.where(valid, t, 0)
    picked = jnp.take_along_axis(logp, t_safe[:, None, :, :], axis=1)[:, 0]
    loss = jnp.where(valid, -picked, 0.0)
    return jnp.sum(loss) / jnp.sum(valid.astype(jnp.float32))


if __name__ == "__main__":
    key = jax.random.PRNGKey(0)
    k_x, k_t, k_m = jax.random.split(key, 3)

    N, C, H, W = 2, 4, 16, 16
    inputs = jax.random.normal(k_x, (N, C, H, W), dtype=jnp.float32)
    targets = jax.random.randint(k_t, (N, H, W), 0, C, dtype=jnp.int32)
    # Mark ~10% of pixels as ignore_index to exercise the masking path.
    targets = jnp.where(jax.random.uniform(k_m, (N, H, W)) < 0.1,
                        IGNORE_INDEX, targets)

    out = cross_entropy_loss_2d(inputs, targets)
    out = jax.block_until_ready(out)

    ref = _reference(inputs, targets)
    assert jnp.allclose(out, ref, atol=1e-5, rtol=1e-5), (out, ref)

    print("KERNEL_OK")
</pallas_src>

<mosaic_0001>
module attributes {stable_mosaic.version = 11 : i64} {
  func.func @_ce2d_kernel(%arg0: i32, %arg1: i32, %arg2: i32, %arg3: memref<1x4x2x128xf32, #tpu.memory_space<vmem>>, %arg4: memref<1x2x128xi32, #tpu.memory_space<vmem>>, %arg5: memref<1x1x1x1xf32, #tpu.memory_space<vmem>>, %arg6: memref<2x128xf32, #tpu.memory_space<vmem>>) attributes {dimension_semantics = [#tpu.dimension_semantics<parallel>, #tpu.dimension_semantics<parallel>, #tpu.dimension_semantics<arbitrary>], iteration_bounds = array<i64: 2, 1, 1>, scalar_prefetch = 0 : i64, scratch_operands = 1 : i64, tpu.core_type = #tpu.core_type<tc>, window_params = [{transform_indices = @transform_0, window_bounds = array<i64: 1, 4, 2, 128>}, {transform_indices = @transform_1, window_bounds = array<i64: 1, 2, 128>}, {transform_indices = @transform_2, window_bounds = array<i64: 1, 1, 1, 1>}]} {
    %c0_i32 = arith.constant 0 : i32
    %0 = arith.cmpi eq, %arg2, %c0_i32 : i32
    %1 = arith.extui %0 : i1 to i32
    %c0_i32_0 = arith.constant 0 : i32
    %2 = arith.cmpi ne, %1, %c0_i32_0 : i32
    scf.if %2 {
      %cst_17 = arith.constant 0.000000e+00 : f32
      %34 = vector.broadcast %cst_17 : f32 to vector<2x128xf32>
      %c0_18 = arith.constant 0 : index
      %c0_19 = arith.constant 0 : index
      %35 = vector.load %arg6[%c0_18, %c0_19] : memref<2x128xf32, #tpu.memory_space<vmem>>, vector<2x128xf32>
      tpu.vector_store %arg6[%c0_18, %c0_19], %34 {strides = array<i32>} : memref<2x128xf32, #tpu.memory_space<vmem>>, vector<2x128xf32>,
    } else {
    }
    %c0 = arith.constant 0 : index
    %c0_1 = arith.constant 0 : index
    %c0_2 = arith.constant 0 : index
    %c0_3 = arith.constant 0 : index
    %3 = vector.load %arg3[%c0, %c0_1, %c0_2, %c0_3] : memref<1x4x2x128xf32, #tpu.memory_space<vmem>>, vector<1x4x2x128xf32>
    %4 = vector.shape_cast %3 : vector<1x4x2x128xf32> to vector<4x2x128xf32>
    %c0_4 = arith.constant 0 : index
    %c0_5 = arith.constant 0 : index
    %c0_6 = arith.constant 0 : index
    %5 = vector.load %arg4[%c0_4, %c0_5, %c0_6] : memref<1x2x128xi32, #tpu.memory_space<vmem>>, vector<1x2x128xi32>
    %6 = vector.shape_cast %5 : vector<1x2x128xi32> to vector<2x128xi32>
    %cst = arith.constant dense<0xFF800000> : vector<2x128xf32>
    %7 = vector.multi_reduction <maximumf>, %4, %cst [0] : vector<4x2x128xf32> to vector<2x128xf32>
    %8 = vector.shape_cast %7 : vector<2x128xf32> to vector<1x2x128xf32>
    %9 = vector.broadcast %8 : vector<1x2x128xf32> to vector<4x2x128xf32>
    %10 = arith.subf %4, %9 : vector<4x2x128xf32>
    %11 = math.exp %10 : vector<4x2x128xf32>
    %cst_7 = arith.constant dense<0.000000e+00> : vector<2x128xf32>
    %12 = vector.multi_reduction <add>, %11, %cst_7 [0] : vector<4x2x128xf32> to vector<2x128xf32>
    %13 = math.log %12 : vector<2x128xf32>
    %14 = arith.addf %13, %7 : vector<2x128xf32>
    %15 = tpu.iota {dimensions = array<i32: 0>} : vector<4x1x1xi32>
    %16 = vector.shape_cast %6 : vector<2x128xi32> to vector<1x2x128xi32>
    %17 = vector.broadcast %15 : vector<4x1x1xi32> to vector<4x2x128xi32>
    %18 = vector.broadcast %16 : vector<1x2x128xi32> to vector<4x2x128xi32>
    %19 = arith.cmpi eq, %17, %18 : vector<4x2x128xi32>
    %cst_8 = arith.constant 0.000000e+00 : f32
    %20 = vector.broadcast %cst_8 : f32 to vector<4x2x128xf32>
    %21 = arith.select %19, %4, %20 : vector<4x2x128xi1>, vector<4x2x128xf32>
    %cst_9 = arith.constant dense<0.000000e+00> : vector<2x128xf32>
    %22 = vector.multi_reduction <add>, %21, %cst_9 [0] : vector<4x2x128xf32> to vector<2x128xf32>
    %c-1_i32 = arith.constant -1 : i32
    %23 = vector.broadcast %c-1_i32 : i32 to vector<2x128xi32>
    %24 = arith.cmpi ne, %6, %23 : vector<2x128xi32>
    %c0_10 = arith.constant 0 : index
    %c0_11 = arith.constant 0 : index
    %25 = vector.load %arg6[%c0_10, %c0_11] : memref<2x128xf32, #tpu.memory_space<vmem>>, vector<2x128xf32>
    %26 = arith.subf %14, %22 : vector<2x128xf32>
    %cst_12 = arith.constant 0.000000e+00 : f32
    %27 = vector.broadcast %cst_12 : f32 to vector<2x128xf32>
    %28 = arith.select %24, %26, %27 : vector<2x128xi1>, vector<2x128xf32>
    %29 = arith.addf %25, %28 : vector<2x128xf32>
    %c0_13 = arith.constant 0 : index
    %c0_14 = arith.constant 0 : index
    %30 = vector.load %arg6[%c0_13, %c0_14] : memref<2x128xf32, #tpu.memory_space<vmem>>, vector<2x128xf32>
    tpu.vector_store %arg6[%c0_13, %c0_14], %29 {strides = array<i32>} : memref<2x128xf32, #tpu.memory_space<vmem>>, vector<2x128xf32>,
    %c0_i32_15 = arith.constant 0 : i32
    %31 = arith.cmpi eq, %arg2, %c0_i32_15 : i32
    %32 = arith.extui %31 : i1 to i32
    %c0_i32_16 = arith.constant 0 : i32
    %33 = arith.cmpi ne, %32, %c0_i32_16 : i32
    scf.if %33 {
      %c0_17 = arith.constant 0 : index
      %c0_18 = arith.constant 0 : index
      %34 = vector.load %arg6[%c0_17, %c0_18] : memref<2x128xf32, #tpu.memory_space<vmem>>, vector<2x128xf32>
      %35 = vector.shape_cast %34 : vector<2x128xf32> to vector<1x2x128xf32>
      %cst_19 = arith.constant dense<0.000000e+00> : vector<1xf32>
      %36 = vector.multi_reduction <add>, %35, %cst_19 [1, 2] : vector<1x2x128xf32> to vector<1xf32>
      %37 = vector.shape_cast %36 : vector<1xf32> to vector<1x1x1xf32>
      %38 = vector.extract %37[0, 0, 0] : f32 from vector<1x1x1xf32>
      %39 = vector.broadcast %38 : f32 to vector<1x1xf32>
      %c0_20 = arith.constant 0 : index
      %c0_21 = arith.constant 0 : index
      %c0_22 = arith.constant 0 : index
      %c0_23 = arith.constant 0 : index
      %40 = vector.load %arg5[%c0_20, %c0_21, %c0_22, %c0_23] : memref<1x1x1x1xf32, #tpu.memory_space<vmem>>, vector<1x1x1x1xf32>
      %41 = vector.shape_cast %40 : vector<1x1x1x1xf32> to vector<1x1xf32>
      %42 = vector.shape_cast %39 : vector<1x1xf32> to vector<1x1x1x1xf32>
      tpu.vector_store %arg5[%c0_20, %c0_21, %c0_22, %c0_23], %42 {strides = array<i32>} : memref<1x1x1x1xf32, #tpu.memory_space<vmem>>, vector<1x1x1x1xf32>,
    } else {
    }
    return
  }
  func.func @transform_0(%arg0: i32, %arg1: i32, %arg2: i32) -> (i32, i32, i32, i32) {
    %c1_i32 = arith.constant 1 : i32
    %0 = arith.muli %arg1, %c1_i32 : i32
    %1 = arith.addi %0, %arg2 : i32
    %c0_i32 = arith.constant 0 : i32
    %2 = arith.minsi %1, %c0_i32 : i32
    %c0_i32_0 = arith.constant 0 : i32
    %c0_i32_1 = arith.constant 0 : i32
    %c0_i32_2 = arith.constant 0 : i32
    return %arg0, %c0_i32_0, %2, %c0_i32_1 : i32, i32, i32, i32
  }
  func.func @transform_1(%arg0: i32, %arg1: i32, %arg2: i32) -> (i32, i32, i32) {
    %c1_i32 = arith.constant 1 : i32
    %0 = arith.muli %arg1, %c1_i32 : i32
    %1 = arith.addi %0, %arg2 : i32
    %c0_i32 = arith.constant 0 : i32
    %c0_i32_0 = arith.constant 0 : i32
    return %arg0, %1, %c0_i32 : i32, i32, i32
  }
  func.func @transform_2(%arg0: i32, %arg1: i32, %arg2: i32) -> (i32, i32, i32, i32) {
    %c0_i32 = arith.constant 0 : i32
    %c0_i32_0 = arith.constant 0 : i32
    %c0_i32_1 = arith.constant 0 : i32
    return %arg0, %arg1, %c0_i32, %c0_i32_0 : i32, i32, i32, i32
  }
}

</mosaic_0001>

<bundles_post_ra>
// kernel: cross_entropy_loss_2d.1
= control target key start
LH: loop header
LB: loop body
LE: loop exit
PB: predicated region body
PF: predicated region fallthrough
CT: control target
= control target key end

     0   :  { %s489_s9 = smov 0   ;;  %s491_s10 = smov 0   ;;  %s543_s0 = inlined_call_operand.vmem [shape: f32[2,4,2,128], index: 0, kind: input, shape index: {}]   ;;  %s544_s1 = inlined_call_operand.vmem [shape: s32[2,2,128], index: 1, kind: input, shape index: {}]   ;;  %s545_s2 = inlined_call_operand.vmem [shape: f32[2,1,1,1], index: 2, kind: output, shape index: {}]  }
   0x1   :  { %s493_s11 = smov 0  }
   0x2 LB: > { %s31_s12 = sadd.s32 1, %s467_s10  ;;  %p405_p0 = scmp.ge.s32.totalorder %s471_s11, 1  ;;  %s471_s11 = sphi %s493_s11, %s12_s11   ;;  %s467_s10 = sphi %s491_s10, %s547_s10   ;;  %s463_s9 = sphi %s489_s9, %s546_s9  }
   0x3   : > { %p33_p1 = scmp.ge.s32.totalorder %s31_s12, 2  ;;  %p168_p2 = scmp.lt.s32.totalorder %s471_s11, 3 }
   0x5   : > { %s549_s12 = smov (%p33_p1, %s31_s12), 0  ;;  %p169_p3 = pnand %p405_p0, %p168_p2 }
   0x6   : > { %p208_p4 = scmp.lt.s32.totalorder (!%p169_p3), %s463_s9, 1  ;;  %v473_v0 = vmov (!%p169_p3), 0.0   ;;  %vm244_vm0 = vcmask (!%p169_p3), 1041408   ;;  %vm310_vm6 = vcmask (!%p169_p3), 0  }
   0x7   : > { %172 = sbr.rel (%p169_p3) target bundleno = 282 (0x11a), region = 28  ;;  %238 = vst [vmem:[#allocation2] sm:$0x3] (!%p169_p3), %v473_v0 }
   0xe   : > { %s551_s9 = smov (!%p208_p4, %s463_s9), 1  ;;  %v290_v46 = vld [vmem:[#allocation2] sm:$0x3] }
   0xf   : > { %s411_s13 = sshll.u32 %s551_s9, 3  ;;  %s408_s17 = sshll.u32 %s551_s9, 1 }
  0x10   : > { %s215_s16 = scalar_lea.vmem %s543_s0, %s411_s13  ;;  %s226_s20 = scalar_lea.vmem %s544_s1, %s408_s17 }
  0x11   : > { %v239_v1 = vld [vmem:[%s215_s16] sm:$0x3]  ;;  %v240_v2 = vld [vmem:[%s215_s16 + $0x2] sm:$0x3]  ;;  %v241_v3 = vld [vmem:[%s215_s16 + $0x4] sm:$0x3]  ;;  %s233_s23 = scalar_lea.vmem %s545_s2, %s551_s9 }
  0x12   : > { %v242_v4 = vld [vmem:[%s215_s16 + $0x6] sm:$0x3]  ;;  %v245_v5 = vsel %vm244_vm0, %v239_v1, -inf  ;;  %v246_v6 = vsel %vm244_vm0, %v240_v2, -inf  ;;  %v247_v7 = vsel %vm244_vm0, %v241_v3, -inf }
  0x13   : > { %v248_v8 = vsel %vm244_vm0, %v242_v4, -inf  ;;  %v249_v9 = vmax.f32 %v245_v5, %v246_v6  ;;  %v243_v21 = vld [vmem:[%s226_s20] sm:$0x3] }
  0x14   : > { %v250_v10 = vmax.f32 %v247_v7, %v248_v8  ;;  %vm274_vm1 = vcmp.eq.s32.totalorder %v243_v21, 0  ;;  %vm275_vm2 = vcmp.eq.s32.totalorder %v243_v21, 1  ;;  %vm276_vm3 = vcmp.eq.s32.totalorder %v243_v21, 2 }
  0x15   : > { %v278_v31 = vsel %vm274_vm1, %v239_v1, 0.0  ;;  %v279_v32 = vsel %vm275_vm2, %v240_v2, 0.0  ;;  %v280_v36 = vsel %vm276_vm3, %v241_v3, 0.0  ;;  %vm277_vm4 = vcmp.eq.s32.totalorder %v243_v21, 3 }
  0x16   : > { %v251_v11 = vmax.f32 %v249_v9, %v250_v10  ;;  %v282_v34 = vsel %vm244_vm0, %v278_v31, 0.0  ;;  %v283_v35 = vsel %vm244_vm0, %v279_v32, 0.0  ;;  %v285_v38 = vsel %vm244_vm0, %v280_v36, 0.0 }
  0x17   : > { %v284_v37 = vadd.f32 %v283_v35, %v282_v34  ;;  %v281_v39 = vsel %vm277_vm4, %v242_v4, 0.0  ;;  %vm289_vm5 = vcmp.ne.s32.totalorder %v243_v21, 4294967295 }
  0x18   : > { %v252_v12 = vsub.f32 %v239_v1, %v251_v11  ;;  %v253_v13 = vsub.f32 %v240_v2, %v251_v11  ;;  %v254_v14 = vsub.f32 %v241_v3, %v251_v11  ;;  %v255_v15 = vsub.f32 %v242_v4, %v251_v11 }
  0x19   : > { %v286_v40 = vadd.f32 %v285_v38, %v284_v37  ;;  %v287_v41 = vsel %vm244_vm0, %v281_v39, 0.0 }
  0x1a   : > { %v256_v16 = vmul.f32 1.442695, %v252_v12  ;;  %v258_v17 = vmul.f32 1.442695, %v253_v13  ;;  %v260_v18 = vmul.f32 1.442695, %v254_v14 }
  0x1b   : > { %v262_v19 = vmul.f32 1.442695, %v255_v15  ;;  %v288_v44 = vadd.f32 %v287_v41, %v286_v40 }
  0x1c   : > { %439 = vpow2.f32 %v256_v16 }
  0x1d   : > { %441 = vpow2.f32 %v258_v17 }
  0x1e   : > { %443 = vpow2.f32 %v260_v18 }
  0x1f   : > { %445 = vpow2.f32 %v262_v19 }
  0x26   : > { %v440_v20 = vpop.eup %439 }
  0x27   : > { %v442_v22 = vpop.eup %441  ;;  %v264_v23 = vsel %vm244_vm0, %v440_v20, 0.0 }
  0x28   : > { %v444_v24 = vpop.eup %443  ;;  %v265_v25 = vsel %vm244_vm0, %v442_v22, 0.0 }
  0x29   : > { %v446_v26 = vpop.eup %445  ;;  %v266_v27 = vadd.f32 %v265_v25, %v264_v23  ;;  %v267_v28 = vsel %vm244_vm0, %v444_v24, 0.0 }
  0x2a   : > { %v269_v29 = vsel %vm244_vm0, %v446_v26, 0.0 }
  0x2b   : > { %v268_v30 = vadd.f32 %v267_v28, %v266_v27 }
  0x2d   : > { %v270_v33 = vadd.f32 %v269_v29, %v268_v30 }
  0x2f   : > { %447 = vlog2.f32 %v270_v33 }
  0x39   : > { %v448_v42 = vpop.eup %447 }
  0x3a   : > { %v272_v43 = vmul.f32 0.6931472, %v448_v42 }
  0x3c   : > { %v273_v45 = vadd.f32 %v272_v43, %v251_v11 }
  0x3e   : > { %v291_v47 = vsub.f32 %v273_v45, %v288_v44 }
  0x40   : > { %v292_v48 = vsel %vm289_vm5, %v291_v47, 0.0 }
  0x41   : > { %v293_v49 = vadd.f32 %v292_v48, %v290_v46 }
  0x43   : > { %294 = vst [vmem:[#allocation2] sm:$0x3] %v293_v49 }
  0x4a   : > { %v298_v50 = vld [vmem:[#allocation2] sm:$0x3] }
  0x4b   : > { %v299_v51 = vsel %vm244_vm0, %v298_v50, 0.0 }
  0x4c   : > { %300 = vadd.xlane.f32.xlu0 %v299_v51 }
  0xd9   : > { %v301_v52 = vpop.xlane.xlu0 %300 }
  0xda   : > { %v302_v53 = vrot.slane %v301_v52, 4 }
  0xdc   : > { %v303_v54 = vadd.f32 %v302_v53, %v301_v52 }
  0xde   : > { %v304_v55 = vrot.slane %v303_v54, 2 }
  0xe0   : > { %v305_v56 = vadd.f32 %v304_v55, %v303_v54 }
  0xe2   : > { %v306_v57 = vrot.slane %v305_v56, 1 }
  0xe4   : > { %v307_v58 = vadd.f32 %v306_v57, %v305_v56 }
  0xe6   : > { %412 = vpush %v307_v58 }
 0x117   : > { %s413_s24 = spop %412 }
 0x118   : > { %v309_v59 = vstv %s413_s24 }
 0x119   : > { %311 = vst.msk [vmem:[%s233_s23] sm:$0x1] %vm310_vm6, %v309_v59 }
 0x11a PF: > { %s12_s11 = sadd.s32 1, %s471_s11   ;;  %s546_s9 = smov %s467_s10 }
 0x11b   : > { %p9_p5 = scmp.ge.s32.totalorder %s12_s11, 4   ;;  %s547_s10 = smov %s549_s12 }
 0x11d   :  { %11 = sbr.rel (!%p9_p5) target bundleno = 2 (0x2), region = 69 }

</bundles_post_ra>
